<compile_context>
chip_gen: v7x
topology: tpu7x:2x2x1
jax: 0.10.0
libtpu: 0.0.40
codegen_flags: <defaults>
</compile_context>

<pallas_src>
import functools

import jax
import jax.numpy as jnp
from jax.experimental import pallas as pl
from jax.experimental.pallas import tpu as pltpu

LANES = 128
_TARGET_BLOCK_BYTES = 2 * 1024 * 1024     # per-input block per grid step
_VMEM_LIMIT_BYTES = 32 * 1024 * 1024      # 2 in x 2 bufs x 2 MiB + out << 32 MiB


def _tc_count():
    """Best-effort TensorCore count per device (1 is always a safe answer)."""
    try:
        info = pltpu.get_tpu_info()
        for name in ("num_cores", "core_count", "tensorcore_count",
                     "num_tensorcores"):
            v = getattr(info, name, None)
            if isinstance(v, int) and v > 0:
                return v
    except Exception:
        pass
    try:
        kind = jax.devices()[0].device_kind.lower()
        if any(t in kind for t in ("v4", "v5p", "v7")):
            return 2
    except Exception:
        pass
    return 1


def _ssd_kernel(zp_ref, zt_ref, part_ref, *, row_tile, steps, valid_rows,
                need_mask):
    """Accumulate sum((zp - zt)^2) of one (row_tile, 128) tile into an
    (8, 128) vector accumulator held in the output block."""
    p = pl.program_id(0)
    k = pl.program_id(1)

    @pl.when(k == 0)
    def _():
        part_ref[...] = jnp.zeros_like(part_ref)

    d = zp_ref[...].astype(jnp.float32) - zt_ref[...].astype(jnp.float32)
    sq = d * d

    if need_mask:
        # Partial / duplicated boundary blocks contain garbage rows (and
        # different garbage for zp vs zt), so zero the squared diffs of any
        # global row >= valid_rows.  Pure VPU filler under the DMA bound.
        row0 = (p * steps + k) * row_tile
        row_ids = row0 + jax.lax.broadcasted_iota(
            jnp.int32, (row_tile, LANES), 0)
        sq = jnp.where(row_ids < valid_rows, sq, 0.0)

    # Whole-vreg VALU adds only; no per-step cross-lane reduction.
    acc = jnp.sum(sq.reshape(row_tile // 8, 8, LANES), axis=0)
    part_ref[...] += acc[None, :, :]


def _sum_sq_diff(z_pred, z_true, *, block_rows=None):
    """sum((z_pred - z_true)**2) over all elements, as an f32 scalar."""
    n = z_pred.size
    item_p = jnp.dtype(z_pred.dtype).itemsize
    item_t = jnp.dtype(z_true.dtype).itemsize
    # Packed sublane multiple for the narrower dtype: 8 (4B), 16 (2B), 32 (1B).
    sub = max(8, 32 // max(1, min(item_p, item_t)))

    zp = z_pred.reshape(-1)
    zt = z_true.reshape(-1)

    rows = n // LANES
    tail = n - rows * LANES

    tail_ssd = jnp.float32(0.0)
    if tail:
        # < 128 leftover elements: tiny jnp sum (kernel only needs n % 128 == 0
        # for the free (rows, 128) reshape of the main body).
        tp = zp[rows * LANES:].astype(jnp.float32)
        tt = zt[rows * LANES:].astype(jnp.float32)
        tail_ssd = jnp.sum((tp - tt) ** 2)

    if rows < sub:
        # Too small for one aligned block; do the whole thing in plain jnp.
        if rows:
            hp = zp[: rows * LANES].astype(jnp.float32)
            ht = zt[: rows * LANES].astype(jnp.float32)
            tail_ssd = tail_ssd + jnp.sum((hp - ht) ** 2)
        return tail_ssd

    if tail:
        zp_main = zp[: rows * LANES]
        zt_main = zt[: rows * LANES]
    else:
        zp_main = zp
        zt_main = zt
    zp2 = zp_main.reshape(rows, LANES)
    zt2 = zt_main.reshape(rows, LANES)

    # Row tile: ~_TARGET_BLOCK_BYTES per input block (dtype-scaled), aligned to
    # the packed sublane multiple, never exceeding the data (so every block's
    # start row stays in bounds; only the last block may be partial).
    if block_rows is None:
        block_rows = max(sub, _TARGET_BLOCK_BYTES // (LANES * item_p))
    rt = max(sub, (int(block_rows) // sub) * sub)
    rt = min(rt, max(sub, (rows // sub) * sub))

    num_blocks = pl.cdiv(rows, rt)

    # Split the stream across TensorCores only when the chip has >1 TC and
    # there is enough work; single-TC chips keep a single slice (no wasted
    # extra chunks).
    tc = _tc_count()
    num_parallel = tc if (tc > 1 and num_blocks >= 4 * tc) else 1
    steps = pl.cdiv(num_blocks, num_parallel)

    need_mask = (num_parallel * steps * rt) != rows

    if num_parallel * steps == num_blocks:
        def in_map(p, k):
            return (p * steps + k, 0)
    else:
        last = num_blocks - 1

        def in_map(p, k):
            # Clamp so DMAs never index past the last real block; the in-kernel
            # row mask zeroes the duplicated blocks' contribution.
            return (jnp.minimum(p * steps + k, last), 0)

    out_bytes = num_parallel * 8 * LANES * 4
    cost = pl.CostEstimate(
        flops=3 * rows * LANES,
        transcendentals=0,
        bytes_accessed=rows * LANES * (item_p + item_t) + out_bytes,
    )

    kernel = functools.partial(_ssd_kernel, row_tile=rt, steps=steps,
                               valid_rows=rows, need_mask=need_mask)

    # TODO(synk): on v7x, verify with xprof that the "parallel" axis actually
    # shards across both TensorCores; if not, switch to pltpu.CORE_PARALLEL.
    partials = pl.pallas_call(
        kernel,
        out_shape=jax.ShapeDtypeStruct((num_parallel, 8, LANES), jnp.float32),
        grid_spec=pltpu.PrefetchScalarGridSpec(
            num_scalar_prefetch=0,
            grid=(num_parallel, steps),
            in_specs=[
                pl.BlockSpec((rt, LANES), in_map),   # z_pred
                pl.BlockSpec((rt, LANES), in_map),   # z_true
            ],
            out_specs=pl.BlockSpec((1, 8, LANES), lambda p, k: (p, 0, 0)),
        ),
        compiler_params=pltpu.CompilerParams(
            dimension_semantics=("parallel", "arbitrary"),
            vmem_limit_bytes=_VMEM_LIMIT_BYTES),
        cost_estimate=cost,
    )(zp2, zt2)

    # Single tiny cross-lane reduce, done once outside the streaming loop.
    return jnp.sum(partials) + tail_ssd


def lcl_loss(z_pred, z_true, kl_loss, *, beta=1.0, block_rows=None):
    """Pallas implementation of LCLLoss.forward.

    Returns (total_loss, (recon_loss, kl_loss)) as JAX scalars.
    """
    assert z_pred.shape == z_true.shape
    n_elems = z_pred.size
    ssd = _sum_sq_diff(z_pred, z_true, block_rows=block_rows)
    recon = ssd / jnp.float32(n_elems)          # nn.MSELoss(reduction='mean')
    kl = jnp.asarray(kl_loss, dtype=jnp.float32)
    total = recon + jnp.float32(beta) * kl
    # TODO(synk): PyTorch returns recon.item()/kl.item() (host syncs); we return
    # device scalars so the function stays jittable — callers may .item().
    return total, (recon, kl)


if __name__ == "__main__":
    key = jax.random.PRNGKey(0)
    k1, k2, k3, k4, k5, k6, k7 = jax.random.split(key, 7)

    beta = 1.0
    kl_loss = jnp.abs(jax.random.normal(k3, (), dtype=jnp.float32))

    # 1) Small VAE-style latent (B, C, H, W): single-block fast path, fp32,
    #    driven through jit to confirm the wrapper is jittable.
    z_pred = jax.random.normal(k1, (2, 4, 16, 16), dtype=jnp.float32)
    z_true = jax.random.normal(k2, (2, 4, 16, 16), dtype=jnp.float32)
    loss_fn = jax.jit(lambda zp, zt, kl: lcl_loss(zp, zt, kl, beta=beta))
    total, (recon, kl_out) = loss_fn(z_pred, z_true, kl_loss)
    total = jax.block_until_ready(total)
    recon_ref = jnp.mean((z_pred - z_true) ** 2)
    total_ref = recon_ref + beta * kl_loss
    assert jnp.allclose(total, total_ref, rtol=1e-5, atol=1e-5), (total, total_ref)
    assert jnp.allclose(recon, recon_ref, rtol=1e-5, atol=1e-5), (recon, recon_ref)
    assert jnp.allclose(kl_out, kl_loss)

    # 2) bf16 latent with a row count that does not divide the block: exercises
    #    bf16 streaming and the in-kernel boundary-row mask (no jnp.pad).
    zp_b = jax.random.normal(k4, (3, 8, 33, 64), dtype=jnp.bfloat16)
    zt_b = jax.random.normal(k5, (3, 8, 33, 64), dtype=jnp.bfloat16)
    total_b, (recon_b, _) = lcl_loss(zp_b, zt_b, kl_loss, beta=beta)
    total_b = jax.block_until_ready(total_b)
    recon_ref_b = jnp.mean(
        (zp_b.astype(jnp.float32) - zt_b.astype(jnp.float32)) ** 2)
    total_ref_b = recon_ref_b + beta * kl_loss
    assert jnp.allclose(total_b, total_ref_b, rtol=1e-4, atol=1e-4), (
        total_b, total_ref_b)
    assert jnp.allclose(recon_b, recon_ref_b, rtol=1e-4, atol=1e-4)

    # 3) Ragged size (n % 128 != 0): exercises the wrapper tail sum plus the
    #    masked partial last block.
    zp_r = jax.random.normal(k6, (3, 5, 7, 11), dtype=jnp.float32)
    zt_r = jax.random.normal(k7, (3, 5, 7, 11), dtype=jnp.float32)
    total_r, (recon_r, _) = lcl_loss(zp_r, zt_r, kl_loss, beta=beta)
    total_r = jax.block_until_ready(total_r)
    recon_ref_r = jnp.mean((zp_r - zt_r) ** 2)
    assert jnp.allclose(recon_r, recon_ref_r, rtol=1e-5, atol=1e-5), (
        recon_r, recon_ref_r)

    # 4) Multi-step exact-division path (no mask), forced small block.
    zp_m = jax.random.normal(k1, (8, 8, 64, 64), dtype=jnp.float32)
    zt_m = jax.random.normal(k2, (8, 8, 64, 64), dtype=jnp.float32)
    total_m, (recon_m, _) = lcl_loss(zp_m, zt_m, kl_loss, beta=beta,
                                     block_rows=512)
    total_m = jax.block_until_ready(total_m)
    recon_ref_m = jnp.mean((zp_m - zt_m) ** 2)
    assert jnp.allclose(recon_m, recon_ref_m, rtol=1e-5, atol=1e-5), (
        recon_m, recon_ref_m)

    print("KERNEL_OK")
</pallas_src>

<mosaic_0001>
module attributes {stable_mosaic.version = 11 : i64} {
  func.func @_ssd_kernel(%arg0: i32, %arg1: i32, %arg2: memref<16x128xf32, #tpu.memory_space<vmem>>, %arg3: memref<16x128xf32, #tpu.memory_space<vmem>>, %arg4: memref<1x8x128xf32, #tpu.memory_space<vmem>>) attributes {dimension_semantics = [#tpu.dimension_semantics<parallel>, #tpu.dimension_semantics<arbitrary>], iteration_bounds = array<i64: 1, 1>, scalar_prefetch = 0 : i64, scratch_operands = 0 : i64, tpu.core_type = #tpu.core_type<tc>, window_params = [{transform_indices = @transform_0, window_bounds = array<i64: 16, 128>}, {transform_indices = @transform_1, window_bounds = array<i64: 16, 128>}, {transform_indices = @transform_2, window_bounds = array<i64: 1, 8, 128>}]} {
    %c0_i32 = arith.constant 0 : i32
    %0 = arith.cmpi eq, %arg1, %c0_i32 : i32
    %1 = arith.extui %0 : i1 to i32
    %c0_i32_0 = arith.constant 0 : i32
    %2 = arith.cmpi ne, %1, %c0_i32_0 : i32
    scf.if %2 {
      %cst_10 = arith.constant 0.000000e+00 : f32
      %13 = vector.broadcast %cst_10 : f32 to vector<1x8x128xf32>
      %c0_11 = arith.constant 0 : index
      %c0_12 = arith.constant 0 : index
      %c0_13 = arith.constant 0 : index
      %14 = vector.load %arg4[%c0_11, %c0_12, %c0_13] : memref<1x8x128xf32, #tpu.memory_space<vmem>>, vector<1x8x128xf32>
      tpu.vector_store %arg4[%c0_11, %c0_12, %c0_13], %13 {strides = array<i32>} : memref<1x8x128xf32, #tpu.memory_space<vmem>>, vector<1x8x128xf32>,
    } else {
    }
    %c0 = arith.constant 0 : index
    %c0_1 = arith.constant 0 : index
    %3 = vector.load %arg2[%c0, %c0_1] : memref<16x128xf32, #tpu.memory_space<vmem>>, vector<16x128xf32>
    %c0_2 = arith.constant 0 : index
    %c0_3 = arith.constant 0 : index
    %4 = vector.load %arg3[%c0_2, %c0_3] : memref<16x128xf32, #tpu.memory_space<vmem>>, vector<16x128xf32>
    %5 = arith.subf %3, %4 : vector<16x128xf32>
    %6 = arith.mulf %5, %5 : vector<16x128xf32>
    %7 = vector.shape_cast %6 : vector<16x128xf32> to vector<2x8x128xf32>
    %cst = arith.constant dense<0.000000e+00> : vector<8x128xf32>
    %8 = vector.multi_reduction <add>, %7, %cst [0] : vector<2x8x128xf32> to vector<8x128xf32>
    %c0_4 = arith.constant 0 : index
    %c0_5 = arith.constant 0 : index
    %c0_6 = arith.constant 0 : index
    %9 = vector.load %arg4[%c0_4, %c0_5, %c0_6] : memref<1x8x128xf32, #tpu.memory_space<vmem>>, vector<1x8x128xf32>
    %10 = vector.shape_cast %8 : vector<8x128xf32> to vector<1x8x128xf32>
    %11 = arith.addf %9, %10 : vector<1x8x128xf32>
    %c0_7 = arith.constant 0 : index
    %c0_8 = arith.constant 0 : index
    %c0_9 = arith.constant 0 : index
    %12 = vector.load %arg4[%c0_7, %c0_8, %c0_9] : memref<1x8x128xf32, #tpu.memory_space<vmem>>, vector<1x8x128xf32>
    tpu.vector_store %arg4[%c0_7, %c0_8, %c0_9], %11 {strides = array<i32>} : memref<1x8x128xf32, #tpu.memory_space<vmem>>, vector<1x8x128xf32>,
    return
  }
  func.func @transform_0(%arg0: i32, %arg1: i32) -> (i32, i32) {
    %c1_i32 = arith.constant 1 : i32
    %0 = arith.muli %arg0, %c1_i32 : i32
    %1 = arith.addi %0, %arg1 : i32
    %c0_i32 = arith.constant 0 : i32
    %c0_i32_0 = arith.constant 0 : i32
    return %1, %c0_i32 : i32, i32
  }
  func.func @transform_1(%arg0: i32, %arg1: i32) -> (i32, i32) {
    %c1_i32 = arith.constant 1 : i32
    %0 = arith.muli %arg0, %c1_i32 : i32
    %1 = arith.addi %0, %arg1 : i32
    %c0_i32 = arith.constant 0 : i32
    %c0_i32_0 = arith.constant 0 : i32
    return %1, %c0_i32 : i32, i32
  }
  func.func @transform_2(%arg0: i32, %arg1: i32) -> (i32, i32, i32) {
    %c0_i32 = arith.constant 0 : i32
    %c0_i32_0 = arith.constant 0 : i32
    %c0_i32_1 = arith.constant 0 : i32
    return %arg0, %c0_i32, %c0_i32_0 : i32, i32, i32
  }
}

</mosaic_0001>

<bundles_post_ra>
// kernel: _lambda_.1
= control target key start
LH: loop header
LB: loop body
LE: loop exit
PB: predicated region body
PF: predicated region fallthrough
CT: control target
= control target key end

     0   :  { %s119_s0 = inlined_call_operand.vmem [shape: f32[16,128], index: 0, kind: input, shape index: {}]   ;;  %s120_s1 = inlined_call_operand.vmem [shape: f32[16,128], index: 1, kind: input, shape index: {}]   ;;  %s121_s2 = inlined_call_operand.vmem [shape: f32[1,8,128], index: 2, kind: output, shape index: {}]  }
   0x1   :  { %v60_v0 = vld [vmem:[%s119_s0] sm:$0xff]  ;;  %v61_v1 = vld [vmem:[%s119_s0 + $0x8] sm:$0xff] }
   0x2   :  { %v62_v2 = vld [vmem:[%s120_s1] sm:$0xff]  ;;  %v63_v3 = vld [vmem:[%s120_s1 + $0x8] sm:$0xff] }
   0x3   :  { %v64_v4 = vsub.f32 %v60_v0, %v62_v2  ;;  %v65_v5 = vsub.f32 %v61_v1, %v63_v3 }
   0x5   :  { %v66_v6 = vmul.f32 %v64_v4, %v64_v4  ;;  %v67_v7 = vmul.f32 %v65_v5, %v65_v5 }
   0x7   :  { %v68_v8 = vadd.f32 %v67_v7, %v66_v6 }
   0x9   :  { %71 = vst [vmem:[%s121_s2] sm:$0xff] %v68_v8 }

</bundles_post_ra>
